<compile_context>
chip_gen: v6e
topology: v6e:2x2x1
jax: 0.10.0
libtpu: 0.0.40
codegen_flags: <defaults>
</compile_context>

<pallas_src>
import functools

import jax
import jax.numpy as jnp
from jax.experimental import pallas as pl
from jax.experimental.pallas import tpu as pltpu


def attention_block_kernel(x_ref, gamma_ref, beta_ref, dww_ref, dwb_ref,
                           w1t_ref, b1_ref, w2_ref, b2_ref, o_ref,
                           *, ker_size, eps):
    # ---- load & upcast (bf16 I/O supported; all math stays in f32) ----
    x = x_ref[...].astype(jnp.float32)                       # (TB, C, L)
    _, _, L = x.shape
    pad = (ker_size - 1) // 2

    # ---- LayerNorm over L: fused single-pass stats (sum and sum-of-squares).
    # Accumulation is in f32; inputs here are LN-scale so E[x^2]-mu^2
    # cancellation is benign.
    inv_l = 1.0 / L
    mu = jnp.sum(x, axis=-1, keepdims=True) * inv_l           # (TB, C, 1)
    ex2 = jnp.sum(x * x, axis=-1, keepdims=True) * inv_l      # (TB, C, 1)
    var = ex2 - mu * mu
    inv = jax.lax.rsqrt(var + eps)
    xn = (x - mu) * inv * gamma_ref[...] + beta_ref[...]      # gamma/beta: (1,1,L)

    # ---- Spatial attention: depthwise 'same' conv1d via XLU lane rotations
    # plus cheap edge masks (no lane-misaligned pad/concat/slice copies).
    dww = dww_ref[0]                                          # (C, K)
    dwb = dwb_ref[0]                                          # (C, 1)
    lane = jax.lax.broadcasted_iota(jnp.int32, (1, 1, L), 2)
    acc = None
    for k in range(ker_size):                                 # static unroll
        d = k - pad                                           # tap offset into xn
        shift = (-d) % L
        tap = pltpu.roll(xn, shift=shift, axis=2) if shift else xn
        if d > 0:                                             # wrapped tail -> 0
            tap = jnp.where(lane < (L - d), tap, 0.0)
        elif d < 0:                                           # wrapped head -> 0
            tap = jnp.where(lane >= (-d), tap, 0.0)
        term = dww[:, k:k + 1] * tap
        acc = (term + dwb) if acc is None else (acc + term)   # bias folded into tap 0
    y = xn * jax.nn.sigmoid(acc)

    # ---- Channel attention (SE): layout-friendly, no (C,1)<->(1,C) relayouts.
    pooled = jnp.mean(y, axis=-1, keepdims=True)              # (TB, C, 1)
    # fc1: w1 passed pre-transposed as (1, C, Cr); sublane reduce over C.
    h = jnp.sum(w1t_ref[...] * pooled, axis=1, keepdims=True) + b1_ref[...]   # (TB,1,Cr)
    h = jnp.maximum(h, 0.0)
    # fc2: w2 is (1, C, Cr); lane reduce over Cr.
    cw = jnp.sum(w2_ref[...] * h, axis=-1, keepdims=True) + b2_ref[...]       # (TB,C,1)
    cw = jax.nn.sigmoid(cw)

    o_ref[...] = (y * cw).astype(o_ref.dtype)


def _pick_batch_tile(B, C, L, itemsize):
    """~1 MiB per (TB,C,L) tile: keeps double-buffered in+out tiles well under
    v7x's 32 MiB scoped-VMEM default, and keeps >= 2 grid steps so both v7x
    TensorCores get work (grid axis is 'parallel')."""
    target_bytes = 1 << 20
    tb = max(1, target_bytes // max(1, C * L * itemsize))
    if B >= 2:
        tb = min(tb, -(-B // 2))          # at least 2 grid steps
    return min(tb, B)


def attention_block(x, gamma, beta, dw_weight, dw_bias, w1, b1, w2, b2,
                    *, ker_size=7, eps=1e-5, batch_tile=None):
    B, C, L = x.shape
    Cr = w1.shape[0]
    tb = batch_tile if batch_tile is not None else _pick_batch_tile(
        B, C, L, jnp.dtype(x.dtype).itemsize)
    n_steps = -(-B // tb)
    Bp = n_steps * tb
    if Bp != B:                            # pad batch to a multiple of the tile
        x = jnp.pad(x, ((0, Bp - B), (0, 0), (0, 0)))

    f32 = jnp.float32
    gamma3 = gamma.reshape(1, 1, L).astype(f32)
    beta3 = beta.reshape(1, 1, L).astype(f32)
    dww3 = dw_weight.reshape(1, C, ker_size).astype(f32)
    dwb3 = dw_bias.reshape(1, C, 1).astype(f32)
    w1t3 = w1.T.reshape(1, C, Cr).astype(f32)   # pre-transposed for sublane reduce
    b1_3 = b1.reshape(1, 1, Cr).astype(f32)
    w2_3 = w2.reshape(1, C, Cr).astype(f32)
    b2_3 = b2.reshape(1, C, 1).astype(f32)

    def full(shape):
        return pl.BlockSpec(shape, lambda b: (0,) * len(shape))

    kernel = functools.partial(attention_block_kernel, ker_size=ker_size, eps=eps)

    out = pl.pallas_call(
        kernel,
        out_shape=jax.ShapeDtypeStruct((Bp, C, L), x.dtype),
        grid_spec=pltpu.PrefetchScalarGridSpec(
            num_scalar_prefetch=0,
            grid=(n_steps,),
            in_specs=[
                pl.BlockSpec((tb, C, L), lambda b: (b, 0, 0)),   # x batch tile
                full((1, 1, L)),          # gamma
                full((1, 1, L)),          # beta
                full((1, C, ker_size)),   # depthwise weight
                full((1, C, 1)),          # depthwise bias
                full((1, C, Cr)),         # fc1 weight (pre-transposed)
                full((1, 1, Cr)),         # fc1 bias
                full((1, C, Cr)),         # fc2 weight
                full((1, C, 1)),          # fc2 bias
            ],
            out_specs=pl.BlockSpec((tb, C, L), lambda b: (b, 0, 0)),
        ),
        compiler_params=pltpu.CompilerParams(dimension_semantics=("parallel",)),
    )(x, gamma3, beta3, dww3, dwb3, w1t3, b1_3, w2_3, b2_3)

    return out[:B] if Bp != B else out


def attention_block_ref(x, gamma, beta, dw_weight, dw_bias, w1, b1, w2, b2,
                        *, ker_size=7, eps=1e-5):
    """Pure-JAX reference mirroring the PyTorch Attention_Block forward."""
    mu = jnp.mean(x, axis=-1, keepdims=True)
    var = jnp.mean((x - mu) ** 2, axis=-1, keepdims=True)
    xn = (x - mu) / jnp.sqrt(var + eps) * gamma + beta
    pad = (ker_size - 1) // 2
    xpad = jnp.pad(xn, ((0, 0), (0, 0), (pad, pad)))
    L = x.shape[-1]
    conv = sum(dw_weight[None, :, k:k + 1] * xpad[:, :, k:k + L]
               for k in range(ker_size))
    sw = jax.nn.sigmoid(conv + dw_bias[None, :, None])
    y = xn * sw
    pooled = jnp.mean(y, axis=-1)                              # (B, C)
    h = jax.nn.relu(pooled @ w1.T + b1)                        # (B, Cr)
    cw = jax.nn.sigmoid(h @ w2.T + b2)                         # (B, C)
    return y * cw[:, :, None]


if __name__ == "__main__":
    def run_case(B, C, L, ker_size, reduction, seed):
        Cr = max(1, C // reduction)
        ks = jax.random.split(jax.random.PRNGKey(seed), 7)
        x = jax.random.normal(ks[0], (B, C, L), jnp.float32)
        gamma = 1.0 + 0.1 * jax.random.normal(ks[1], (L,), jnp.float32)
        beta = 0.1 * jax.random.normal(ks[2], (L,), jnp.float32)
        dw_weight = 0.2 * jax.random.normal(ks[3], (C, ker_size), jnp.float32)
        dw_bias = 0.1 * jax.random.normal(ks[4], (C,), jnp.float32)
        w1 = 0.2 * jax.random.normal(ks[5], (Cr, C), jnp.float32)
        b1 = jnp.zeros((Cr,), jnp.float32)
        w2 = 0.2 * jax.random.normal(ks[6], (C, Cr), jnp.float32)
        b2 = jnp.zeros((C,), jnp.float32)

        out = attention_block(x, gamma, beta, dw_weight, dw_bias, w1, b1, w2, b2,
                              ker_size=ker_size)
        out = jax.block_until_ready(out)
        ref = attention_block_ref(x, gamma, beta, dw_weight, dw_bias, w1, b1, w2, b2,
                                  ker_size=ker_size)
        assert out.shape == ref.shape
        assert jnp.allclose(out, ref, atol=1e-4, rtol=1e-4), f"mismatch (B={B})"

    # small case matching ResSCANet6 attention block shapes (batch tile = 1, 2 grid steps)
    run_case(B=2, C=32, L=128, ker_size=7, reduction=16, seed=0)
    # batched-tile + batch-padding path, ker_size=9 (as in the first ResSCANet6 block)
    run_case(B=5, C=32, L=128, ker_size=9, reduction=16, seed=1)
    print("KERNEL_OK")
</pallas_src>

<mosaic_0001>
module attributes {stable_mosaic.version = 11 : i64} {
  func.func @attention_block_kernel(%arg0: i32, %arg1: memref<1x32x128xf32, #tpu.memory_space<vmem>>, %arg2: memref<1x1x128xf32, #tpu.memory_space<vmem>>, %arg3: memref<1x1x128xf32, #tpu.memory_space<vmem>>, %arg4: memref<1x32x7xf32, #tpu.memory_space<vmem>>, %arg5: memref<1x32x1xf32, #tpu.memory_space<vmem>>, %arg6: memref<1x32x2xf32, #tpu.memory_space<vmem>>, %arg7: memref<1x1x2xf32, #tpu.memory_space<vmem>>, %arg8: memref<1x32x2xf32, #tpu.memory_space<vmem>>, %arg9: memref<1x32x1xf32, #tpu.memory_space<vmem>>, %arg10: memref<1x32x128xf32, #tpu.memory_space<vmem>>) attributes {dimension_semantics = [#tpu.dimension_semantics<parallel>], iteration_bounds = array<i64: 2>, scalar_prefetch = 0 : i64, scratch_operands = 0 : i64, tpu.core_type = #tpu.core_type<tc>, window_params = [{transform_indices = @transform_0, window_bounds = array<i64: 1, 32, 128>}, {pipeline_mode = #tpu.pipeline_mode<synchronous>, transform_indices = @transform_1, window_bounds = array<i64: 1, 1, 128>}, {pipeline_mode = #tpu.pipeline_mode<synchronous>, transform_indices = @transform_2, window_bounds = array<i64: 1, 1, 128>}, {pipeline_mode = #tpu.pipeline_mode<synchronous>, transform_indices = @transform_3, window_bounds = array<i64: 1, 32, 7>}, {pipeline_mode = #tpu.pipeline_mode<synchronous>, transform_indices = @transform_4, window_bounds = array<i64: 1, 32, 1>}, {pipeline_mode = #tpu.pipeline_mode<synchronous>, transform_indices = @transform_5, window_bounds = array<i64: 1, 32, 2>}, {pipeline_mode = #tpu.pipeline_mode<synchronous>, transform_indices = @transform_6, window_bounds = array<i64: 1, 1, 2>}, {pipeline_mode = #tpu.pipeline_mode<synchronous>, transform_indices = @transform_7, window_bounds = array<i64: 1, 32, 2>}, {pipeline_mode = #tpu.pipeline_mode<synchronous>, transform_indices = @transform_8, window_bounds = array<i64: 1, 32, 1>}, {transform_indices = @transform_9, window_bounds = array<i64: 1, 32, 128>}]} {
    %c0 = arith.constant 0 : index
    %c0_0 = arith.constant 0 : index
    %c0_1 = arith.constant 0 : index
    %0 = vector.load %arg1[%c0, %c0_0, %c0_1] : memref<1x32x128xf32, #tpu.memory_space<vmem>>, vector<1x32x128xf32>
    %cst = arith.constant dense<0.000000e+00> : vector<1x32xf32>
    %1 = vector.multi_reduction <add>, %0, %cst [2] : vector<1x32x128xf32> to vector<1x32xf32>
    %2 = vector.shape_cast %1 : vector<1x32xf32> to vector<1x32x1xf32>
    %cst_2 = arith.constant 7.812500e-03 : f32
    %3 = vector.broadcast %cst_2 : f32 to vector<1x32x1xf32>
    %4 = arith.mulf %2, %3 : vector<1x32x1xf32>
    %5 = arith.mulf %0, %0 : vector<1x32x128xf32>
    %cst_3 = arith.constant dense<0.000000e+00> : vector<1x32xf32>
    %6 = vector.multi_reduction <add>, %5, %cst_3 [2] : vector<1x32x128xf32> to vector<1x32xf32>
    %7 = vector.shape_cast %6 : vector<1x32xf32> to vector<1x32x1xf32>
    %cst_4 = arith.constant 7.812500e-03 : f32
    %8 = vector.broadcast %cst_4 : f32 to vector<1x32x1xf32>
    %9 = arith.mulf %7, %8 : vector<1x32x1xf32>
    %10 = arith.mulf %4, %4 : vector<1x32x1xf32>
    %11 = arith.subf %9, %10 : vector<1x32x1xf32>
    %cst_5 = arith.constant 9.99999974E-6 : f32
    %12 = vector.broadcast %cst_5 : f32 to vector<1x32x1xf32>
    %13 = arith.addf %11, %12 : vector<1x32x1xf32>
    %14 = math.rsqrt %13 : vector<1x32x1xf32>
    %15 = vector.broadcast %4 : vector<1x32x1xf32> to vector<1x32x128xf32>
    %16 = arith.subf %0, %15 : vector<1x32x128xf32>
    %17 = vector.broadcast %14 : vector<1x32x1xf32> to vector<1x32x128xf32>
    %18 = arith.mulf %16, %17 : vector<1x32x128xf32>
    %c0_6 = arith.constant 0 : index
    %c0_7 = arith.constant 0 : index
    %c0_8 = arith.constant 0 : index
    %19 = vector.load %arg2[%c0_6, %c0_7, %c0_8] : memref<1x1x128xf32, #tpu.memory_space<vmem>>, vector<1x1x128xf32>
    %20 = vector.broadcast %19 : vector<1x1x128xf32> to vector<1x32x128xf32>
    %21 = arith.mulf %18, %20 : vector<1x32x128xf32>
    %c0_9 = arith.constant 0 : index
    %c0_10 = arith.constant 0 : index
    %c0_11 = arith.constant 0 : index
    %22 = vector.load %arg3[%c0_9, %c0_10, %c0_11] : memref<1x1x128xf32, #tpu.memory_space<vmem>>, vector<1x1x128xf32>
    %23 = vector.broadcast %22 : vector<1x1x128xf32> to vector<1x32x128xf32>
    %24 = arith.addf %21, %23 : vector<1x32x128xf32>
    %c0_12 = arith.constant 0 : index
    %c0_13 = arith.constant 0 : index
    %c0_14 = arith.constant 0 : index
    %25 = vector.load %arg4[%c0_12, %c0_13, %c0_14] : memref<1x32x7xf32, #tpu.memory_space<vmem>>, vector<1x32x7xf32>
    %26 = vector.shape_cast %25 : vector<1x32x7xf32> to vector<32x7xf32>
    %c0_15 = arith.constant 0 : index
    %c0_16 = arith.constant 0 : index
    %c0_17 = arith.constant 0 : index
    %27 = vector.load %arg5[%c0_15, %c0_16, %c0_17] : memref<1x32x1xf32, #tpu.memory_space<vmem>>, vector<1x32x1xf32>
    %28 = vector.shape_cast %27 : vector<1x32x1xf32> to vector<32x1xf32>
    %29 = tpu.iota {dimensions = array<i32: 2>} : vector<1x1x128xi32>
    %c3_i32 = arith.constant 3 : i32
    %30 = tpu.dynamic_rotate %24 by %c3_i32 dim 2 : vector<1x32x128xf32>, i32 -> vector<1x32x128xf32>
    %c3_i32_18 = arith.constant 3 : i32
    %31 = vector.broadcast %c3_i32_18 : i32 to vector<1x1x128xi32>
    %32 = arith.cmpi sge, %29, %31 : vector<1x1x128xi32>
    %cst_19 = arith.constant 0.000000e+00 : f32
    %33 = vector.shape_cast %32 : vector<1x1x128xi1> to vector<1x1x128xi1>
    %34 = vector.broadcast %33 : vector<1x1x128xi1> to vector<1x32x128xi1>
    %35 = vector.broadcast %cst_19 : f32 to vector<1x32x128xf32>
    %36 = arith.select %34, %30, %35 : vector<1x32x128xi1>, vector<1x32x128xf32>
    %37 = vector.extract_strided_slice %26 {offsets = [0, 0], sizes = [32, 1], strides = [1, 1]} : vector<32x7xf32> to vector<32x1xf32>
    %38 = vector.shape_cast %37 : vector<32x1xf32> to vector<1x32x1xf32>
    %39 = vector.broadcast %38 : vector<1x32x1xf32> to vector<1x32x128xf32>
    %40 = arith.mulf %39, %36 : vector<1x32x128xf32>
    %41 = vector.shape_cast %28 : vector<32x1xf32> to vector<1x32x1xf32>
    %42 = vector.broadcast %41 : vector<1x32x1xf32> to vector<1x32x128xf32>
    %43 = arith.addf %40, %42 : vector<1x32x128xf32>
    %c2_i32 = arith.constant 2 : i32
    %44 = tpu.dynamic_rotate %24 by %c2_i32 dim 2 : vector<1x32x128xf32>, i32 -> vector<1x32x128xf32>
    %c2_i32_20 = arith.constant 2 : i32
    %45 = vector.broadcast %c2_i32_20 : i32 to vector<1x1x128xi32>
    %46 = arith.cmpi sge, %29, %45 : vector<1x1x128xi32>
    %cst_21 = arith.constant 0.000000e+00 : f32
    %47 = vector.shape_cast %46 : vector<1x1x128xi1> to vector<1x1x128xi1>
    %48 = vector.broadcast %47 : vector<1x1x128xi1> to vector<1x32x128xi1>
    %49 = vector.broadcast %cst_21 : f32 to vector<1x32x128xf32>
    %50 = arith.select %48, %44, %49 : vector<1x32x128xi1>, vector<1x32x128xf32>
    %51 = vector.extract_strided_slice %26 {offsets = [0, 1], sizes = [32, 1], strides = [1, 1]} : vector<32x7xf32> to vector<32x1xf32>
    %52 = vector.shape_cast %51 : vector<32x1xf32> to vector<1x32x1xf32>
    %53 = vector.broadcast %52 : vector<1x32x1xf32> to vector<1x32x128xf32>
    %54 = arith.mulf %53, %50 : vector<1x32x128xf32>
    %55 = arith.addf %43, %54 : vector<1x32x128xf32>
    %c1_i32 = arith.constant 1 : i32
    %56 = tpu.dynamic_rotate %24 by %c1_i32 dim 2 : vector<1x32x128xf32>, i32 -> vector<1x32x128xf32>
    %c1_i32_22 = arith.constant 1 : i32
    %57 = vector.broadcast %c1_i32_22 : i32 to vector<1x1x128xi32>
    %58 = arith.cmpi sge, %29, %57 : vector<1x1x128xi32>
    %cst_23 = arith.constant 0.000000e+00 : f32
    %59 = vector.shape_cast %58 : vector<1x1x128xi1> to vector<1x1x128xi1>
    %60 = vector.broadcast %59 : vector<1x1x128xi1> to vector<1x32x128xi1>
    %61 = vector.broadcast %cst_23 : f32 to vector<1x32x128xf32>
    %62 = arith.select %60, %56, %61 : vector<1x32x128xi1>, vector<1x32x128xf32>
    %63 = vector.extract_strided_slice %26 {offsets = [0, 2], sizes = [32, 1], strides = [1, 1]} : vector<32x7xf32> to vector<32x1xf32>
    %64 = vector.shape_cast %63 : vector<32x1xf32> to vector<1x32x1xf32>
    %65 = vector.broadcast %64 : vector<1x32x1xf32> to vector<1x32x128xf32>
    %66 = arith.mulf %65, %62 : vector<1x32x128xf32>
    %67 = arith.addf %55, %66 : vector<1x32x128xf32>
    %68 = vector.extract_strided_slice %26 {offsets = [0, 3], sizes = [32, 1], strides = [1, 1]} : vector<32x7xf32> to vector<32x1xf32>
    %69 = vector.shape_cast %68 : vector<32x1xf32> to vector<1x32x1xf32>
    %70 = vector.broadcast %69 : vector<1x32x1xf32> to vector<1x32x128xf32>
    %71 = arith.mulf %70, %24 : vector<1x32x128xf32>
    %72 = arith.addf %67, %71 : vector<1x32x128xf32>
    %c127_i32 = arith.constant 127 : i32
    %73 = tpu.dynamic_rotate %24 by %c127_i32 dim 2 : vector<1x32x128xf32>, i32 -> vector<1x32x128xf32>
    %c127_i32_24 = arith.constant 127 : i32
    %74 = vector.broadcast %c127_i32_24 : i32 to vector<1x1x128xi32>
    %75 = arith.cmpi slt, %29, %74 : vector<1x1x128xi32>
    %cst_25 = arith.constant 0.000000e+00 : f32
    %76 = vector.shape_cast %75 : vector<1x1x128xi1> to vector<1x1x128xi1>
    %77 = vector.broadcast %76 : vector<1x1x128xi1> to vector<1x32x128xi1>
    %78 = vector.broadcast %cst_25 : f32 to vector<1x32x128xf32>
    %79 = arith.select %77, %73, %78 : vector<1x32x128xi1>, vector<1x32x128xf32>
    %80 = vector.extract_strided_slice %26 {offsets = [0, 4], sizes = [32, 1], strides = [1, 1]} : vector<32x7xf32> to vector<32x1xf32>
    %81 = vector.shape_cast %80 : vector<32x1xf32> to vector<1x32x1xf32>
    %82 = vector.broadcast %81 : vector<1x32x1xf32> to vector<1x32x128xf32>
    %83 = arith.mulf %82, %79 : vector<1x32x128xf32>
    %84 = arith.addf %72, %83 : vector<1x32x128xf32>
    %c126_i32 = arith.constant 126 : i32
    %85 = tpu.dynamic_rotate %24 by %c126_i32 dim 2 : vector<1x32x128xf32>, i32 -> vector<1x32x128xf32>
    %c126_i32_26 = arith.constant 126 : i32
    %86 = vector.broadcast %c126_i32_26 : i32 to vector<1x1x128xi32>
    %87 = arith.cmpi slt, %29, %86 : vector<1x1x128xi32>
    %cst_27 = arith.constant 0.000000e+00 : f32
    %88 = vector.shape_cast %87 : vector<1x1x128xi1> to vector<1x1x128xi1>
    %89 = vector.broadcast %88 : vector<1x1x128xi1> to vector<1x32x128xi1>
    %90 = vector.broadcast %cst_27 : f32 to vector<1x32x128xf32>
    %91 = arith.select %89, %85, %90 : vector<1x32x128xi1>, vector<1x32x128xf32>
    %92 = vector.extract_strided_slice %26 {offsets = [0, 5], sizes = [32, 1], strides = [1, 1]} : vector<32x7xf32> to vector<32x1xf32>
    %93 = vector.shape_cast %92 : vector<32x1xf32> to vector<1x32x1xf32>
    %94 = vector.broadcast %93 : vector<1x32x1xf32> to vector<1x32x128xf32>
    %95 = arith.mulf %94, %91 : vector<1x32x128xf32>
    %96 = arith.addf %84, %95 : vector<1x32x128xf32>
    %c125_i32 = arith.constant 125 : i32
    %97 = tpu.dynamic_rotate %24 by %c125_i32 dim 2 : vector<1x32x128xf32>, i32 -> vector<1x32x128xf32>
    %c125_i32_28 = arith.constant 125 : i32
    %98 = vector.broadcast %c125_i32_28 : i32 to vector<1x1x128xi32>
    %99 = arith.cmpi slt, %29, %98 : vector<1x1x128xi32>
    %cst_29 = arith.constant 0.000000e+00 : f32
    %100 = vector.shape_cast %99 : vector<1x1x128xi1> to vector<1x1x128xi1>
    %101 = vector.broadcast %100 : vector<1x1x128xi1> to vector<1x32x128xi1>
    %102 = vector.broadcast %cst_29 : f32 to vector<1x32x128xf32>
    %103 = arith.select %101, %97, %102 : vector<1x32x128xi1>, vector<1x32x128xf32>
    %104 = vector.extract_strided_slice %26 {offsets = [0, 6], sizes = [32, 1], strides = [1, 1]} : vector<32x7xf32> to vector<32x1xf32>
    %105 = vector.shape_cast %104 : vector<32x1xf32> to vector<1x32x1xf32>
    %106 = vector.broadcast %105 : vector<1x32x1xf32> to vector<1x32x128xf32>
    %107 = arith.mulf %106, %103 : vector<1x32x128xf32>
    %108 = arith.addf %96, %107 : vector<1x32x128xf32>
    %109 = arith.negf %108 : vector<1x32x128xf32>
    %110 = math.exp %109 : vector<1x32x128xf32>
    %cst_30 = arith.constant 1.000000e+00 : f32
    %111 = vector.broadcast %cst_30 : f32 to vector<1x32x128xf32>
    %112 = arith.addf %111, %110 : vector<1x32x128xf32>
    %113 = arith.divf %111, %112 : vector<1x32x128xf32>
    %114 = arith.mulf %24, %113 : vector<1x32x128xf32>
    %cst_31 = arith.constant dense<0.000000e+00> : vector<1x32xf32>
    %115 = vector.multi_reduction <add>, %114, %cst_31 [2] : vector<1x32x128xf32> to vector<1x32xf32>
    %116 = vector.shape_cast %115 : vector<1x32xf32> to vector<1x32x1xf32>
    %cst_32 = arith.constant 1.280000e+02 : f32
    %117 = vector.broadcast %cst_32 : f32 to vector<1x32x1xf32>
    %118 = arith.divf %116, %117 : vector<1x32x1xf32>
    %c0_33 = arith.constant 0 : index
    %c0_34 = arith.constant 0 : index
    %c0_35 = arith.constant 0 : index
    %119 = vector.load %arg6[%c0_33, %c0_34, %c0_35] : memref<1x32x2xf32, #tpu.memory_space<vmem>>, vector<1x32x2xf32>
    %120 = vector.broadcast %118 : vector<1x32x1xf32> to vector<1x32x2xf32>
    %121 = arith.mulf %119, %120 : vector<1x32x2xf32>
    %cst_36 = arith.constant dense<0.000000e+00> : vector<1x2xf32>
    %122 = vector.multi_reduction <add>, %121, %cst_36 [1] : vector<1x32x2xf32> to vector<1x2xf32>
    %123 = vector.shape_cast %122 : vector<1x2xf32> to vector<1x1x2xf32>
    %c0_37 = arith.constant 0 : index
    %c0_38 = arith.constant 0 : index
    %c0_39 = arith.constant 0 : index
    %124 = vector.load %arg7[%c0_37, %c0_38, %c0_39] : memref<1x1x2xf32, #tpu.memory_space<vmem>>, vector<1x1x2xf32>
    %125 = arith.addf %123, %124 : vector<1x1x2xf32>
    %cst_40 = arith.constant 0.000000e+00 : f32
    %126 = vector.broadcast %cst_40 : f32 to vector<1x1x2xf32>
    %127 = arith.maximumf %125, %126 : vector<1x1x2xf32>
    %c0_41 = arith.constant 0 : index
    %c0_42 = arith.constant 0 : index
    %c0_43 = arith.constant 0 : index
    %128 = vector.load %arg8[%c0_41, %c0_42, %c0_43] : memref<1x32x2xf32, #tpu.memory_space<vmem>>, vector<1x32x2xf32>
    %129 = vector.broadcast %127 : vector<1x1x2xf32> to vector<1x32x2xf32>
    %130 = arith.mulf %128, %129 : vector<1x32x2xf32>
    %cst_44 = arith.constant dense<0.000000e+00> : vector<1x32xf32>
    %131 = vector.multi_reduction <add>, %130, %cst_44 [2] : vector<1x32x2xf32> to vector<1x32xf32>
    %132 = vector.shape_cast %131 : vector<1x32xf32> to vector<1x32x1xf32>
    %c0_45 = arith.constant 0 : index
    %c0_46 = arith.constant 0 : index
    %c0_47 = arith.constant 0 : index
    %133 = vector.load %arg9[%c0_45, %c0_46, %c0_47] : memref<1x32x1xf32, #tpu.memory_space<vmem>>, vector<1x32x1xf32>
    %134 = arith.addf %132, %133 : vector<1x32x1xf32>
    %135 = arith.negf %134 : vector<1x32x1xf32>
    %136 = math.exp %135 : vector<1x32x1xf32>
    %cst_48 = arith.constant 1.000000e+00 : f32
    %137 = vector.broadcast %cst_48 : f32 to vector<1x32x1xf32>
    %138 = arith.addf %137, %136 : vector<1x32x1xf32>
    %139 = arith.divf %137, %138 : vector<1x32x1xf32>
    %140 = vector.broadcast %139 : vector<1x32x1xf32> to vector<1x32x128xf32>
    %141 = arith.mulf %114, %140 : vector<1x32x128xf32>
    %c0_49 = arith.constant 0 : index
    %c0_50 = arith.constant 0 : index
    %c0_51 = arith.constant 0 : index
    %142 = vector.load %arg10[%c0_49, %c0_50, %c0_51] : memref<1x32x128xf32, #tpu.memory_space<vmem>>, vector<1x32x128xf32>
    tpu.vector_store %arg10[%c0_49, %c0_50, %c0_51], %141 {strides = array<i32>} : memref<1x32x128xf32, #tpu.memory_space<vmem>>, vector<1x32x128xf32>,
    return
  }
  func.func @transform_0(%arg0: i32) -> (i32, i32, i32) {
    %c0_i32 = arith.constant 0 : i32
    %c0_i32_0 = arith.constant 0 : i32
    %c0_i32_1 = arith.constant 0 : i32
    return %arg0, %c0_i32, %c0_i32_0 : i32, i32, i32
  }
  func.func @transform_1(%arg0: i32) -> (i32, i32, i32) {
    %c0_i32 = arith.constant 0 : i32
    %c0_i32_0 = arith.constant 0 : i32
    %c0_i32_1 = arith.constant 0 : i32
    %c0_i32_2 = arith.constant 0 : i32
    return %c0_i32, %c0_i32_0, %c0_i32_1 : i32, i32, i32
  }
  func.func @transform_2(%arg0: i32) -> (i32, i32, i32) {
    %c0_i32 = arith.constant 0 : i32
    %c0_i32_0 = arith.constant 0 : i32
    %c0_i32_1 = arith.constant 0 : i32
    %c0_i32_2 = arith.constant 0 : i32
    return %c0_i32, %c0_i32_0, %c0_i32_1 : i32, i32, i32
  }
  func.func @transform_3(%arg0: i32) -> (i32, i32, i32) {
    %c0_i32 = arith.constant 0 : i32
    %c0_i32_0 = arith.constant 0 : i32
    %c0_i32_1 = arith.constant 0 : i32
    %c0_i32_2 = arith.constant 0 : i32
    return %c0_i32, %c0_i32_0, %c0_i32_1 : i32, i32, i32
  }
  func.func @transform_4(%arg0: i32) -> (i32, i32, i32) {
    %c0_i32 = arith.constant 0 : i32
    %c0_i32_0 = arith.constant 0 : i32
    %c0_i32_1 = arith.constant 0 : i32
    %c0_i32_2 = arith.constant 0 : i32
    return %c0_i32, %c0_i32_0, %c0_i32_1 : i32, i32, i32
  }
  func.func @transform_5(%arg0: i32) -> (i32, i32, i32) {
    %c0_i32 = arith.constant 0 : i32
    %c0_i32_0 = arith.constant 0 : i32
    %c0_i32_1 = arith.constant 0 : i32
    %c0_i32_2 = arith.constant 0 : i32
    return %c0_i32, %c0_i32_0, %c0_i32_1 : i32, i32, i32
  }
  func.func @transform_6(%arg0: i32) -> (i32, i32, i32) {
    %c0_i32 = arith.constant 0 : i32
    %c0_i32_0 = arith.constant 0 : i32
    %c0_i32_1 = arith.constant 0 : i32
    %c0_i32_2 = arith.constant 0 : i32
    return %c0_i32, %c0_i32_0, %c0_i32_1 : i32, i32, i32
  }
  func.func @transform_7(%arg0: i32) -> (i32, i32, i32) {
    %c0_i32 = arith.constant 0 : i32
    %c0_i32_0 = arith.constant 0 : i32
    %c0_i32_1 = arith.constant 0 : i32
    %c0_i32_2 = arith.constant 0 : i32
    return %c0_i32, %c0_i32_0, %c0_i32_1 : i32, i32, i32
  }
  func.func @transform_8(%arg0: i32) -> (i32, i32, i32) {
    %c0_i32 = arith.constant 0 : i32
    %c0_i32_0 = arith.constant 0 : i32
    %c0_i32_1 = arith.constant 0 : i32
    %c0_i32_2 = arith.constant 0 : i32
    return %c0_i32, %c0_i32_0, %c0_i32_1 : i32, i32, i32
  }
  func.func @transform_9(%arg0: i32) -> (i32, i32, i32) {
    %c0_i32 = arith.constant 0 : i32
    %c0_i32_0 = arith.constant 0 : i32
    %c0_i32_1 = arith.constant 0 : i32
    return %arg0, %c0_i32, %c0_i32_0 : i32, i32, i32
  }
}

</mosaic_0001>

<bundles_post_ra>
// kernel: tpu_custom_call.1
= control target key start
LH: loop header
LB: loop body
LE: loop exit
PB: predicated region body
PF: predicated region fallthrough
CT: control target
= control target key end

     0   :  { %14 = vsyncpa [#allocation3], 0  ;;  %s1591_s0 = inlined_call_operand.vmem [shape: f32[2,32,128], index: 0, kind: input, shape index: {}]   ;;  %s1592_s1 = inlined_call_operand.vmem [shape: f32[1,1,128], index: 1, kind: input, shape index: {}]   ;;  %s1593_s2 = inlined_call_operand.vmem [shape: f32[1,1,128], index: 2, kind: input, shape index: {}]   ;;  %s1594_s3 = inlined_call_operand.vmem [shape: f32[1,32,7], index: 3, kind: input, shape index: {}]   ;;  %s1595_s4 = inlined_call_operand.vmem [shape: f32[1,32,1], index: 4, kind: input, shape index: {}]   ;;  %s1596_s5 = inlined_call_operand.vmem [shape: f32[1,32,2], index: 5, kind: input, shape index: {}]   ;;  %s1597_s6 = inlined_call_operand.vmem [shape: f32[1,1,2], index: 6, kind: input, shape index: {}]   ;;  %s1598_s7 = inlined_call_operand.vmem [shape: f32[1,32,2], index: 7, kind: input, shape index: {}]   ;;  %s1599_s8 = inlined_call_operand.vmem [shape: f32[1,32,1], index: 8, kind: input, shape index: {}]   ;;  %s1600_s9 = inlined_call_operand.hbm [shape: f32[2,32,128], index: 9, kind: output, shape index: {}]  }
   0x1   :  { %16 = vsyncpa [#allocation3 + $0x1], 0  ;;  %s1194_s30 = smov 0   ;;  %s1196_s10 = smov 0  }
   0x2   :  { %s1198_s11 = smov 0   ;;  %s1200_s12 = smov 0  }
   0x3 LB: > { %s1215_s13 = sadd.s32 4294967295, %s1126_s12   ;;  %s927_s14 = sadd.s32 4294967294, %s1126_s12   ;;  %s1126_s12 = sphi %s1200_s12, %s1606_s12   ;;  %s1122_s11 = sphi %s1198_s11, %s1605_s11   ;;  %s1118_s10 = sphi %s1196_s10, %s1604_s10   ;;  %s1114_s30 = sphi %s1194_s30, %s1603_s30  }
   0x4   : > { %s1219_s15 = sadd.s32 1, %s1126_s12   ;;  %s223_s16 = sadd.s32 1, %s1122_s11 }
   0x5   : > { %s220_s17 = ssub.s32 %s1126_s12, %s1219_s15  ;;  %p233_p0 = scmp.ne.s32.totalorder %s1122_s11, %s1118_s10 }
   0x6   : > { %p221_p1 = scmp.eq.s32.totalorder %s220_s17, 0  ;;  %p234_p2 = scmp.eq.s32.totalorder %s1215_s13, 1 }
   0x7   : > { %p239_p3 = scmp.ne.s32.totalorder %s1118_s10, %s1114_s30  ;;  %p240_p4 = scmp.eq.s32.totalorder %s927_s14, 1 }
   0x8   : > { %s1230_s18 = scalar_select %p221_p1, %s1122_s11, %s223_s16  }
   0x9   : > { %p1232_p5 = por %p234_p2, %p233_p0  ;;  %p1236_p6 = por %p240_p4, %p239_p3 }
   0xa   : > { %p930_p7 = scmp.ge.s32.totalorder %s1126_s12, 1  ;;  %p290_p8 = scmp.lt.s32.totalorder %s1126_s12, 3 }
   0xc   : > { %p291_p9 = pnand %p930_p7, %p290_p8 }
   0xd   : > { %p326_p10 = scmp.lt.s32.totalorder (!%p291_p9), %s1215_s13, 1  ;;  %s1136_s23 = smov (!%p291_p9), 2  }
   0xe   : > { %294 = sbr.rel (%p291_p9) target bundleno = 892 (0x37c), region = 56  ;;  %s1137_s24 = smov (!%p291_p9), 1  }
   0xf   : > { %s1139_s26 = smov (!%p291_p9), 126   ;;  %s1140_s27 = smov (!%p291_p9), 125  }
  0x10   : > { %s323_s14 = sand.u32 (!%p291_p9), 1, %s1118_s10  }
  0x11   : > { %s931_s16 = sshll.u32 (!%p291_p9), %s323_s14, 5 }
  0x12   : > { %s325_s17 = scalar_lea.vmem (!%p291_p9), [#allocation2], %s931_s16 }
  0x13   : > { %v1128_v0 = vmov 0   ;;  %v1129_v1 = vmov 1   ;;  %s327_s21 = scalar_select %p326_p10, %s1215_s13, 1  ;;  %v410_v10 = vld [vmem:[%s1594_s3 + $0x8] sm:$0xff]  ;;  %v411_v11 = vld [vmem:[%s1594_s3 + $0x10] sm:$0xff]  ;;  %v413_v12 = vld [vmem:[%s1595_s4] sm:$0xff] }
  0x14   : > { %1005 = vset.pattern.permute.xlu1 %v1128_v0  ;;  %1008 = vset.pattern.permute.xlu0 %v1129_v1  ;;  %v412_v13 = vld [vmem:[%s1594_s3 + $0x18] sm:$0xff]  ;;  %v414_v14 = vld [vmem:[%s1595_s4 + $0x8] sm:$0xff]  ;;  %v1130_v15 = vmov 4   ;;  %v409_v16 = vld [vmem:[%s1594_s3] sm:$0xff]  ;;  %v1131_v17 = vmov 3   ;;  %v1132_v19 = vmov 2  }
  0x15   : > { %s949_s22 = sshll.u32 %s327_s21, 5  ;;  %v415_v18 = vld [vmem:[%s1595_s4 + $0x10] sm:$0xff]  ;;  %v1133_v20 = vmov 5   ;;  %v416_v21 = vld [vmem:[%s1595_s4 + $0x18] sm:$0xff]  ;;  %v1134_v22 = vmov 6   ;;  %vm750_vm6 = vcmask 15360  }
  0x16   : > { %s330_s25 = scalar_lea.vmem %s1591_s0, %s949_s22  ;;  %v934_v55 = vld [vmem:[%s1592_s1] ss:$0 sm:$0xff]  ;;  %s1135_s22 = smov 3  }
  0x17   : > { %v1248_v2 = vld [vmem:[%s330_s25 + $0x10] sm:$0xff]  ;;  %v1250_v3 = vld [vmem:[%s330_s25] sm:$0xff]  ;;  %v1254_v4 = vld [vmem:[%s330_s25 + $0x18] sm:$0xff]  ;;  %s865_s21 = sshll.u32 %s325_s17, 4  ;;  %s1543_s21 = int_to_ptr.vmem [resolvable:$true] %s865_s21 }
  0x18   : > { %339 = vadd.xlane.f32.xlu1 %v1248_v2  ;;  %335 = vadd.xlane.f32.xlu0 %v1250_v3  ;;  %v1256_v5 = vld [vmem:[%s330_s25 + $0x8] sm:$0xff]  ;;  %v347_v7 = vmul.f32 %v1250_v3, %v1250_v3  ;;  %v349_v8 = vmul.f32 %v1248_v2, %v1248_v2  ;;  %v350_v9 = vmul.f32 %v1254_v4, %v1254_v4  ;;  %v935_v59 = vld [vmem:[%s1593_s2] ss:$0 sm:$0xff]  ;;  %s1138_s25 = smov 127  }
  0x19   : > { %v348_v6 = vmul.f32 %v1256_v5, %v1256_v5 }
  0x1c   : > { %341 = vadd.xlane.f32.xlu1 %v1254_v4  ;;  %337 = vadd.xlane.f32.xlu0 %v1256_v5 }
  0x20   : > { %353 = vadd.xlane.f32.xlu0 %v348_v6  ;;  %351 = vadd.xlane.f32.xlu1 %v347_v7 }
  0x24   : > { %355 = vadd.xlane.f32.xlu0 %v349_v8  ;;  %357 = vadd.xlane.f32.xlu1 %v350_v9 }
  0x35   : > { %441 = vperm.xlu1 %1005, %v410_v10  }
  0x39   : > { %446 = vperm.xlu1 %1005, %v411_v11  }
  0x3a   : > { %506 = vperm.xlu0 %1008, %v411_v11  }
  0x3d   : > { %460 = vperm.xlu1 %1005, %v413_v12  }
  0x3e   : > { %510 = vperm.xlu0 %1008, %v412_v13  }
  0x41   : > { %465 = vperm.xlu1 %1005, %v414_v14  }
  0x42   : > { %1015 = vset.pattern.permute.xlu0 %v1130_v15 }
  0x43   : > { %604 = vperm.xlu0 %1015, %v410_v10  }
  0x45   : > { %1006 = vset.pattern.permute.xlu1 %v1129_v1 }
  0x46   : > { %498 = vperm.xlu1 %1006, %v409_v16  }
  0x47   : > { %1016 = vset.pattern.permute.xlu0 %v1131_v17 }
  0x48   : > { %561 = vperm.xlu0 %1016, %v409_v16  }
  0x4a   : > { %502 = vperm.xlu1 %1006, %v410_v10  }
  0x4c   : > { %569 = vperm.xlu0 %1016, %v411_v11  }
  0x4e   : > { %1007 = vset.pattern.permute.xlu1 %v1128_v0 }
  0x4f   : > { %470 = vperm.xlu1 %1007, %v415_v18  }
  0x50   : > { %573 = vperm.xlu0 %1016, %v412_v13  }
  0x53   : > { %1009 = vset.pattern.permute.xlu1 %v1132_v19 }
  0x54   : > { %537 = vperm.xlu1 %1009, %v409_v16   ;;  %1018 = vset.pattern.permute.xlu0 %v1133_v20 }
  0x55   : > { %643 = vperm.xlu0 %1018, %v410_v10  }
  0x58   : > { %541 = vperm.xlu1 %1009, %v410_v10  }
  0x59   : > { %647 = vperm.xlu0 %1018, %v411_v11  }
  0x5c   : > { %1010 = vset.pattern.permute.xlu1 %v1128_v0 }
  0x5d   : > { %475 = vperm.xlu1 %1010, %v416_v21   ;;  %1021 = vset.pattern.permute.xlu0 %v1134_v22 }
  0x5e   : > { %682 = vperm.xlu0 %1021, %v410_v10  }
  0x61   : > { %1011 = vset.pattern.permute.xlu1 %v1132_v19 }
  0x62   : > { %545 = vperm.xlu1 %1011, %v411_v11   ;;  %686 = vperm.xlu0 %1021, %v411_v11  }
  0x66   : > { %1012 = vset.pattern.permute.xlu1 %v1131_v17  ;;  %1023 = vset.pattern.permute.xlu0 %v1128_v0 }
  0x67   : > { %565 = vperm.xlu1 %1012, %v410_v10   ;;  %436 = vperm.xlu0 %1023, %v409_v16  }
  0x6b   : > { %1013 = vset.pattern.permute.xlu1 %v1132_v19  ;;  %451 = vperm.xlu0 %1023, %v412_v13  }
  0x6c   : > { %549 = vperm.xlu1 %1013, %v412_v13  }
  0x70   : > { %1014 = vset.pattern.permute.xlu1 %v1130_v15 }
  0x71   : > { %600 = vperm.xlu1 %1014, %v409_v16  }
  0x75   : > { %608 = vperm.xlu1 %1014, %v411_v11  }
  0x79   : > { %1017 = vset.pattern.permute.xlu1 %v1133_v20 }
  0x7a   : > { %639 = vperm.xlu1 %1017, %v409_v16  }
  0x7e   : > { %1019 = vset.pattern.permute.xlu1 %v1130_v15 }
  0x7f   : > { %612 = vperm.xlu1 %1019, %v412_v13  }
  0x83   : > { %1020 = vset.pattern.permute.xlu1 %v1134_v22 }
  0x84   : > { %678 = vperm.xlu1 %1020, %v409_v16  }
  0x88   : > { %1022 = vset.pattern.permute.xlu1 %v1133_v20 }
  0x89   : > { %651 = vperm.xlu1 %1022, %v412_v13  }
  0x8d   : > { %1024 = vset.pattern.permute.xlu1 %v1134_v22 }
  0x8e   : > { %690 = vperm.xlu1 %1024, %v412_v13  }
  0x92   : > { %1025 = vset.pattern.permute.xlu1 %v1128_v0 }
  0xa1   : > { %v340_v23 = vpop.xlane.xlu1 %339  ;;  %v336_v24 = vpop.xlane.xlu0 %335 }
  0xa2   : > { %v343_v27 = vmul.f32 0.0078125, %v336_v24  ;;  %v345_v30 = vmul.f32 0.0078125, %v340_v23 }
  0xa4   : > { %v363_v34 = vmul.f32 %v343_v27, %v343_v27  ;;  %v365_v39 = vmul.f32 %v345_v30, %v345_v30  ;;  %v379_v52 = vsub.f32 %v1250_v3, %v343_v27  ;;  %v381_v58 = vsub.f32 %v1248_v2, %v345_v30 }
  0xa5   : > { %v342_v25 = vpop.xlane.xlu1 %341  ;;  %v338_v26 = vpop.xlane.xlu0 %337 }
  0xa6   : > { %v344_v28 = vmul.f32 0.0078125, %v338_v26  ;;  %v346_v31 = vmul.f32 0.0078125, %v342_v25 }
  0xa8   : > { %v364_v29 = vmul.f32 %v344_v28, %v344_v28  ;;  %v366_v40 = vmul.f32 %v346_v31, %v346_v31  ;;  %v380_v53 = vsub.f32 %v1256_v5, %v344_v28  ;;  %v382_v6 = vsub.f32 %v1254_v4, %v346_v31 }
  0xa9   : > { %v354_v32 = vpop.xlane.xlu0 %353  ;;  %v352_v33 = vpop.xlane.xlu1 %351 }
  0xaa   : > { %v360_v35 = vmul.f32 0.0078125, %v354_v32  ;;  %v359_v36 = vmul.f32 0.0078125, %v352_v33 }
  0xac   : > { %v368_v37 = vsub.f32 %v360_v35, %v364_v29  ;;  %v367_v38 = vsub.f32 %v359_v36, %v363_v34 }
  0xad   : > { %v356_v41 = vpop.xlane.xlu0 %355  ;;  %v358_v42 = vpop.xlane.xlu1 %357 }
  0xae   : > { %v372_v43 = vadd.f32 1e-05, %v368_v37  ;;  %v371_v44 = vadd.f32 1e-05, %v367_v38  ;;  %v361_v45 = vmul.f32 0.0078125, %v356_v41  ;;  %v362_v46 = vmul.f32 0.0078125, %v358_v42 }
  0xaf   : > { %v417_v42 = vlaneseq }
  0xb0   : > { %1026 = vrsqrt.f32 %v372_v43  ;;  %v369_v47 = vsub.f32 %v361_v45, %v365_v39  ;;  %v370_v48 = vsub.f32 %v362_v46, %v366_v40 }
  0xb1   : > { %1028 = vrsqrt.f32 %v371_v44  ;;  %v1307_v1 = vpop.permute.xlu1 %441  ;;  %v1387_v45 = vand.u32 127, %v417_v42 }
  0xb2   : > { %v373_v49 = vadd.f32 1e-05, %v369_v47  ;;  %v374_v50 = vadd.f32 1e-05, %v370_v48 }
  0xb3   : > { %vm427_vm0 = vcmp.ge.s32.totalorder %v1387_v45, 3  ;;  %vm490_vm1 = vcmp.ge.s32.totalorder %v1387_v45, 2  ;;  %vm529_vm2 = vcmp.ge.s32.totalorder %v1387_v45, 1  ;;  %vm592_vm3 = vcmp.lt.s32.totalorder %v1387_v45, 127 }
  0xb4   : > { %1030 = vrsqrt.f32 %v373_v49  ;;  %vm631_vm4 = vcmp.lt.s32.totalorder %v1387_v45, 126  ;;  %vm670_vm5 = vcmp.lt.s32.totalorder %v1387_v45, 125 }
  0xb5   : > { %1032 = vrsqrt.f32 %v374_v50  ;;  %v1316_v9 = vpop.permute.xlu1 %446  ;;  %v1350_v18 = vpop.permute.xlu0 %506 }
  0xb9   : > { %v1323_v11 = vpop.permute.xlu1 %460  ;;  %v1356_v20 = vpop.permute.xlu0 %510 }
  0xbd   : > { %v1027_v51 = vpop.eup %1026  ;;  %v1328_v12 = vpop.permute.xlu1 %465 }
  0xbe   : > { %v1029_v54 = vpop.eup %1028  ;;  %v384_v56 = vmul.f32 %v1027_v51, %v380_v53  ;;  %v605_v22 = vpop.permute.xlu0 %604 }
  0xbf   : > { %v383_v57 = vmul.f32 %v1029_v54, %v379_v52 }
  0xc0   : > { %v395_v63 = vmul.f32 %v934_v55, %v384_v56 }
  0xc1   : > { %v1031_v60 = vpop.eup %1030  ;;  %v394_v61 = vmul.f32 %v934_v55, %v383_v57  ;;  %v1333_v13 = vpop.permute.xlu1 %498 }
  0xc2   : > { %v385_v62 = vmul.f32 %v1031_v60, %v381_v58  ;;  %v1033_v3 = vpop.eup %1032  ;;  %v1313_v7 = vadd.f32 %v935_v59, %v395_v63 }
  0xc3   : > { %v1305_v0 = vadd.f32 %v935_v59, %v394_v61  ;;  %v386_v8 = vmul.f32 %v1033_v3, %v382_v6  ;;  %v1360_v24 = vpop.permute.xlu0 %561 }
  0xc4   : > { %v396_v5 = vmul.f32 %v934_v55, %v385_v62 }
  0xc5   : > { %419 = vrot.lane.b32.xlu1 %v1305_v0, %s1135_s22  ;;  %v397_v10 = vmul.f32 %v934_v55, %v386_v8  ;;  %v503_v14 = vpop.permute.xlu1 %502 }
  0xc6   : > { %v1311_v2 = vadd.f32 %v935_v59, %v396_v5 }
  0xc7   : > { %v1321_v4 = vadd.f32 %v935_v59, %v397_v10  ;;  %v1364_v26 = vpop.permute.xlu0 %569 }
  0xc8   : > { %423 = vrot.lane.b32.xlu0 %v1311_v2, %s1135_s22 }
  0xc9   : > { %421 = vrot.lane.b32.xlu1 %v1313_v7, %s1135_s22 }
  0xca   : > { %v1341_v15 = vpop.permute.xlu1 %470 }
  0xcb   : > { %v1368_v28 = vpop.permute.xlu0 %573 }
  0xcc   : > { %482 = vrot.lane.b32.xlu0 %v1305_v0, %s1136_s23 }
  0xcd   : > { %484 = vrot.lane.b32.xlu1 %v1313_v7, %s1136_s23 }
  0xcf   : > { %v1346_v16 = vpop.permute.xlu1 %537 }
  0xd0   : > { %486 = vrot.lane.b32.xlu0 %v1311_v2, %s1136_s23  ;;  %v644_v30 = vpop.permute.xlu0 %643 }
  0xd1   : > { %425 = vrot.lane.b32.xlu1 %v1321_v4, %s1135_s22  ;;  %s950_s22 = sshll.u32 %s1215_s13, 9  ;;  %s1141_s13 = smov [#allocation2]  }
  0xd2   : > { %s1070_s28 = sshll.u32 %s1141_s13, 4  ;;  %s1071_s28 = int_to_ptr.vmem [resolvable:$false] %s1070_s28 }
  0xd3   : > { %v542_v17 = vpop.permute.xlu1 %541  ;;  %s1072_s29 = scalar_lea.vmem %s1071_s28, 1024  ;;  %p1073_p0 = scmp.lt.s32.totalorder %s1543_s21, %s1071_s28 }
  0xd4   : > { %523 = vrot.lane.b32.xlu0 %v1313_v7, %s1137_s24  ;;  %v1374_v32 = vpop.permute.xlu0 %647 }
  0xd5   : > { %521 = vrot.lane.b32.xlu1 %v1305_v0, %s1137_s24 }
  0xd8   : > { %586 = vrot.lane.b32.xlu0 %v1313_v7, %s1138_s25  ;;  %v1353_v19 = vpop.permute.xlu1 %475 }
  0xd9   : > { %488 = vrot.lane.b32.xlu1 %v1321_v4, %s1136_s23  ;;  %v683_v34 = vpop.permute.xlu0 %682 }
  0xdc   : > { %625 = vrot.lane.b32.xlu0 %v1313_v7, %s1139_s26 }
  0xdd   : > { %525 = vrot.lane.b32.xlu1 %v1311_v2, %s1137_s24  ;;  %v1358_v21 = vpop.permute.xlu1 %545  ;;  %v1380_v36 = vpop.permute.xlu0 %686 }
  0xe0   : > { %627 = vrot.lane.b32.xlu0 %v1311_v2, %s1139_s26 }
  0xe1   : > { %527 = vrot.lane.b32.xlu1 %v1321_v4, %s1137_s24 }
  0xe2   : > { %v566_v23 = vpop.permute.xlu1 %565  ;;  %v437_v38 = vpop.permute.xlu0 %436 }
  0xe3   : > { %v577_v5 = vmul.f32 %v566_v23, %v1313_v7 }
  0xe4   : > { %664 = vrot.lane.b32.xlu0 %v1313_v7, %s1140_s27 }
  0xe5   : > { %584 = vrot.lane.b32.xlu1 %v1305_v0, %s1138_s25 }
  0xe6   : > { %v452_v40 = vpop.permute.xlu0 %451 }
  0xe7   : > { %v1362_v25 = vpop.permute.xlu1 %549 }
  0xe8   : > { %629 = vrot.lane.b32.xlu0 %v1321_v4, %s1139_s26 }
  0xe9   : > { %588 = vrot.lane.b32.xlu1 %v1311_v2, %s1138_s25 }
  0xec   : > { %668 = vrot.lane.b32.xlu0 %v1321_v4, %s1140_s27  ;;  %v1366_v27 = vpop.permute.xlu1 %600 }
  0xed   : > { %623 = vrot.lane.b32.xlu1 %v1305_v0, %s1139_s26  ;;  %s1551_s26 = scalar_lea.sflag [#allocation3], %s323_s14 }
  0xf0   : > { %v1370_v29 = vpop.permute.xlu1 %608 }
  0xf1   : > { %590 = vrot.lane.b32.xlu1 %v1321_v4, %s1138_s25  ;;  %s1548_s25 = scalar_lea.hbm %s1600_s9, %s950_s22 }
  0xf5   : > { %662 = vrot.lane.b32.xlu1 %v1305_v0, %s1140_s27  ;;  %v1372_v31 = vpop.permute.xlu1 %639 }
  0xf9   : > { %666 = vrot.lane.b32.xlu1 %v1311_v2, %s1140_s27  ;;  %s1066_s27 = scalar_lea.vmem %s1543_s21, 512 }
  0xfa   : > { %v1376_v33 = vpop.permute.xlu1 %612  ;;  %p1067_p11 = scmp.ne.s32.totalorder %s1543_s21, %s1066_s27  ;;  %p1074_p1 = scmp.lt.s32.totalorder %s1072_s29, %s1066_s27 }
  0xfc   : > { %p1068_p12 = pnand %p1067_p11, %p1232_p5  ;;  %p1075_p2 = por %p1074_p1, %p1073_p0 }
  0xfe   : > { %p1069_p13 = pneg %p1068_p12 }
  0xff   : > { %v1378_v35 = vpop.permute.xlu1 %678 }
 0x100   : > { %p1076_p3 = pnand %p1075_p2, %p1069_p13 }
 0x104   : > { %v1382_v37 = vpop.permute.xlu1 %651 }
 0x109   : > { %v1384_v39 = vpop.permute.xlu1 %690 }
 0x137   : > { %v420_v41 = vpop.permute.xlu1 %419 }
 0x13a   : > { %v424_v43 = vpop.permute.xlu0 %423 }
 0x13b   : > { %v422_v44 = vpop.permute.xlu1 %421  ;;  %v432_v23 = vsel %vm427_vm0, %v424_v43, 0.0 }
 0x13c   : > { %v431_v49 = vsel %vm427_vm0, %v422_v44, 0.0  ;;  %v430_v44 = vsel %vm427_vm0, %v420_v41, 0.0 }
 0x13d   : > { %v455_v52 = vmul.f32 %v1307_v1, %v431_v49 }
 0x13e   : > { %v483_v46 = vpop.permute.xlu0 %482 }
 0x13f   : > { %v485_v47 = vpop.permute.xlu1 %484  ;;  %v479_v57 = vadd.f32 %v1328_v12, %v455_v52 }
 0x140   : > { %v494_v51 = vsel %vm490_vm1, %v485_v47, 0.0 }
 0x141   : > { %v514_v56 = vmul.f32 %v503_v14, %v494_v51 }
 0x142   : > { %v487_v48 = vpop.permute.xlu0 %486 }
 0x143   : > { %v426_v50 = vpop.permute.xlu1 %425  ;;  %v518_v61 = vadd.f32 %v514_v56, %v479_v57  ;;  %v454_v56 = vmul.f32 %v437_v38, %v430_v44 }
 0x144   : > { %v433_v47 = vsel %vm427_vm0, %v426_v50, 0.0  ;;  %v495_v50 = vsel %vm490_vm1, %v487_v48, 0.0 }
 0x145   : > { %v457_v57 = vmul.f32 %v452_v40, %v433_v47  ;;  %v515_v48 = vmul.f32 %v1350_v18, %v495_v50  ;;  %v578_v47 = vmul.f32 %v1364_v26, %v1311_v2 }
 0x146   : > { %v524_v53 = vpop.permute.xlu0 %523 }
 0x147   : > { %v533_v54 = vsel %vm529_vm2, %v524_v53, 0.0  ;;  %v522_v55 = vpop.permute.xlu1 %521 }
 0x148   : > { %v553_v58 = vmul.f32 %v542_v17, %v533_v54  ;;  %v532_v43 = vsel %vm529_vm2, %v522_v55, 0.0 }
 0x149   : > { %v552_v55 = vmul.f32 %v1346_v16, %v532_v43 }
 0x14a   : > { %v587_v59 = vpop.permute.xlu0 %586  ;;  %v557_v62 = vadd.f32 %v553_v58, %v518_v61  ;;  %v456_v58 = vmul.f32 %v1316_v9, %v432_v23  ;;  %v478_v9 = vadd.f32 %v1323_v11, %v454_v56 }
 0x14b   : > { %v489_v60 = vpop.permute.xlu1 %488  ;;  %v596_v1 = vsel %vm592_vm3, %v587_v59, 0.0 }
 0x14c   : > { %v581_v8 = vadd.f32 %v577_v5, %v557_v62  ;;  %v616_v10 = vmul.f32 %v605_v22, %v596_v1  ;;  %v496_v53 = vsel %vm490_vm1, %v489_v60, 0.0  ;;  %v481_v62 = vadd.f32 %v1353_v19, %v457_v57 }
 0x14d   : > { %v516_v60 = vmul.f32 %v1356_v20, %v496_v53 }
 0x14e   : > { %v626_v63 = vpop.permute.xlu0 %625  ;;  %v620_v49 = vadd.f32 %v616_v10, %v581_v8 }
 0x14f   : > { %v526_v3 = vpop.permute.xlu1 %525  ;;  %v635_v6 = vsel %vm631_vm4, %v626_v63, 0.0 }
 0x150   : > { %v655_v17 = vmul.f32 %v644_v30, %v635_v6  ;;  %v493_v30 = vsel %vm490_vm1, %v483_v46, 0.0 }
 0x151   : > { %v513_v46 = vmul.f32 %v1333_v13, %v493_v30  ;;  %v480_v13 = vadd.f32 %v1341_v15, %v456_v58  ;;  %v576_v15 = vmul.f32 %v1360_v24, %v1305_v0 }
 0x152   : > { %v1407_v12 = vpop.permute.xlu0 %627  ;;  %v659_v54 = vadd.f32 %v655_v17, %v620_v49 }
 0x153   : > { %v528_v14 = vpop.permute.xlu1 %527  ;;  %v517_v5 = vadd.f32 %v513_v46, %v478_v9  ;;  %v519_v8 = vadd.f32 %v515_v48, %v480_v13 }
 0x154   : > { %v535_v59 = vsel %vm529_vm2, %v528_v14, 0.0 }
 0x155   : > { %v555_v63 = vmul.f32 %v1362_v25, %v535_v59  ;;  %v556_v11 = vadd.f32 %v552_v55, %v517_v5 }
 0x156   : > { %v665_v51 = vpop.permute.xlu0 %664 }
 0x157   : > { %v674_v22 = vsel %vm670_vm5, %v665_v51, 0.0  ;;  %v585_v52 = vpop.permute.xlu1 %584 }
 0x158   : > { %v694_v41 = vmul.f32 %v683_v34, %v674_v22  ;;  %v534_v34 = vsel %vm529_vm2, %v526_v3, 0.0  ;;  %v520_v3 = vadd.f32 %v516_v60, %v481_v62  ;;  %v595_v18 = vsel %vm592_vm3, %v585_v52, 0.0 }
 0x159   : > { %v554_v20 = vmul.f32 %v1358_v21, %v534_v34  ;;  %v579_v21 = vmul.f32 %v1368_v28, %v1321_v4  ;;  %v615_v14 = vmul.f32 %v1366_v27, %v595_v18  ;;  %v580_v22 = vadd.f32 %v576_v15, %v556_v11  ;;  %v742_v11 = vld [vmem:[%s1596_s5] sm:$0xff] }
 0x15a   : > { %v698_v61 = vadd.f32 %v694_v41, %v659_v54  ;;  %v630_v1 = vpop.permute.xlu0 %629  ;;  %v559_v10 = vadd.f32 %v555_v63, %v520_v3 }
 0x15b   : > { %v589_v38 = vpop.permute.xlu1 %588  ;;  %v558_v19 = vadd.f32 %v554_v20, %v519_v8  ;;  %v637_v49 = vsel %vm631_vm4, %v630_v1, 0.0  ;;  %v619_v53 = vadd.f32 %v615_v14, %v580_v22 }
 0x15c   : > { %v937_v40 = vmul.f32 -1.442695, %v698_v61  ;;  %v597_v16 = vsel %vm592_vm3, %v589_v38, 0.0  ;;  %v583_v52 = vadd.f32 %v579_v21, %v559_v10  ;;  %v657_v26 = vmul.f32 %v1382_v37, %v637_v49  ;;  %v745_v21 = vld [vmem:[%s1596_s5 + $0x18] sm:$0xff] }
 0x15d   : > { %v617_v51 = vmul.f32 %v1370_v29, %v597_v16  ;;  %v582_v27 = vadd.f32 %v578_v47, %v558_v19  ;;  %v636_v29 = vsel %vm631_vm4, %v1407_v12, 0.0  ;;  %v744_v19 = vld [vmem:[%s1596_s5 + $0x10] sm:$0xff] }
 0x15e   : > { %1034 = vpow2.f32 %v937_v40  ;;  %v669_v17 = vpop.permute.xlu0 %668  ;;  %v656_v59 = vmul.f32 %v1374_v32, %v636_v29  ;;  %v764_v29 = vld [vmem:[%s1597_s6] sm:$0x1] }
 0x15f   : > { %v624_v6 = vpop.permute.xlu1 %623  ;;  %v676_v30 = vsel %vm670_vm5, %v669_v17, 0.0  ;;  %v621_v56 = vadd.f32 %v617_v51, %v582_v27 }
 0x160   : > { %v634_v25 = vsel %vm631_vm4, %v624_v6, 0.0  ;;  %v696_v50 = vmul.f32 %v1384_v39, %v676_v30 }
 0x161   : > { %v654_v24 = vmul.f32 %v1372_v31, %v634_v25  ;;  %v660_v48 = vadd.f32 %v656_v59, %v621_v56  ;;  %v769_v59 = vld [vmem:[%s1598_s7 + $0x10] sm:$0xff] }
 0x163   : > { %v591_v44 = vpop.permute.xlu1 %590 }
 0x164   : > { %v598_v23 = vsel %vm592_vm3, %v591_v44, 0.0 }
 0x165   : > { %v618_v28 = vmul.f32 %v1376_v33, %v598_v23  ;;  %v658_v33 = vadd.f32 %v654_v24, %v619_v53 }
 0x167   : > { %v622_v54 = vadd.f32 %v618_v28, %v583_v52  ;;  %v663_v41 = vpop.permute.xlu1 %662 }
 0x168   : > { %v673_v31 = vsel %vm670_vm5, %v663_v41, 0.0  ;;  %v772_v41 = vshrl.u32 %v417_v42, 7  ;;  %v770_v42 = vld [vmem:[%s1598_s7 + $0x18] sm:$0xff] }
 0x169   : > { %v661_v57 = vadd.f32 %v657_v26, %v622_v54  ;;  %v693_v58 = vmul.f32 %v1378_v35, %v673_v31 }
 0x16b   : > { %v1035_v43 = vpop.eup %1034  ;;  %v700_v37 = vadd.f32 %v696_v50, %v661_v57  ;;  %v697_v61 = vadd.f32 %v693_v58, %v658_v33  ;;  %v667_v46 = vpop.permute.xlu1 %666  ;;  %v773_v50 = vsub.s32 0, %v772_v41  ;;  %v768_v57 = vld [vmem:[%s1598_s7 + $0x8] sm:$0xff]  ;;  %v767_v58 = vld [vmem:[%s1598_s7] sm:$0xff] }
 0x16c   : > { %v714_v60 = vadd.f32 1.0, %v1035_v43  ;;  %v675_v12 = vsel %vm670_vm5, %v667_v46, 0.0 }
 0x16d   : > { %v939_v34 = vmul.f32 -1.442695, %v700_v37  ;;  %v936_v38 = vmul.f32 -1.442695, %v697_v61  ;;  %v695_v40 = vmul.f32 %v1380_v36, %v675_v12 }
 0x16e   : > { %1036 = vrcp.f32 %v714_v60 }
 0x16f   : > { %1038 = vpow2.f32 %v939_v34  ;;  %v699_v39 = vadd.f32 %v695_v40, %v660_v48  ;;  %v792_v40 = vld [vmem:[%s1599_s8 + $0x8] sm:$0xff] }
 0x170   : > { %1040 = vpow2.f32 %v936_v38 }
 0x171   : > { %v938_v35 = vmul.f32 -1.442695, %v699_v39  ;;  %v791_v39 = vld [vmem:[%s1599_s8] sm:$0xff] }
 0x173   : > { %1042 = vpow2.f32 %v938_v35 }
 0x17b   : > { %v1037_v9 = vpop.eup %1036 }
 0x17c   : > { %v1039_v32 = vpop.eup %1038  ;;  %v1475_v62 = vmul.f32 %v1037_v9, %v1313_v7 }
 0x17d   : > { %v1041_v55 = vpop.eup %1040  ;;  %v716_v63 = vadd.f32 1.0, %v1039_v32 }
 0x17e   : > { %v713_v45 = vadd.f32 1.0, %v1041_v55  ;;  %731 = vadd.xlane.f32.xlu0 %v1475_v62 }
 0x180   : > { %v1043_v1 = vpop.eup %1042  ;;  %1044 = vrcp.f32 %v713_v45  ;;  %v793_v45 = vld [vmem:[%s1599_s8 + $0x10] sm:$0xff] }
 0x181   : > { %v715_v13 = vadd.f32 1.0, %v1043_v1  ;;  %1046 = vrcp.f32 %v716_v63  ;;  %v794_v63 = vld [vmem:[%s1599_s8 + $0x18] sm:$0xff] }
 0x183   : > { %1048 = vrcp.f32 %v715_v13 }
 0x18d   : > { %v1045_v36 = vpop.eup %1044 }
 0x18e   : > { %v1479_v20 = vmul.f32 %v1045_v36, %v1305_v0  ;;  %v1047_v5 = vpop.eup %1046  ;;  %v743_v0 = vld [vmem:[%s1596_s5 + $0x8] sm:$0xff] }
 0x18f   : > { %v1486_v6 = vmul.f32 %v1047_v5, %v1321_v4 }
 0x190   : > { %v1049_v3 = vpop.eup %1048  ;;  %729 = vadd.xlane.f32.xlu1 %v1479_v20 }
 0x191   : > { %v1483_v7 = vmul.f32 %v1049_v3, %v1311_v2 }
 0x193   : > { %733 = vadd.xlane.f32.xlu0 %v1483_v7 }
 0x194   : > { %735 = vadd.xlane.f32.xlu1 %v1486_v6 }
 0x207   : > { %v732_v8 = vpop.xlane.xlu0 %731 }
 0x208   : > { %v739_v18 = vmul.f32 0.0078125, %v732_v8 }
 0x20a   : > { %v747_v16 = vmul.f32 %v743_v0, %v739_v18 }
 0x20c   : > { %v752_v47 = vsel %vm750_vm6, %v747_v16, 0.0 }
 0x219   : > { %v730_v10 = vpop.xlane.xlu1 %729 }
 0x21a   : > { %v738_v2 = vmul.f32 0.0078125, %v730_v10 }
 0x21c   : > { %v746_v4 = vmul.f32 %v742_v11, %v738_v2  ;;  %v734_v25 = vpop.xlane.xlu0 %733 }
 0x21d   : > { %v740_v15 = vmul.f32 0.0078125, %v734_v25  ;;  %v736_v14 = vpop.xlane.xlu1 %735 }
 0x21e   : > { %v751_v17 = vsel %vm750_vm6, %v746_v4, 0.0  ;;  %v741_v44 = vmul.f32 0.0078125, %v736_v14 }
 0x21f   : > { %v748_v49 = vmul.f32 %v744_v19, %v740_v15  ;;  %v753_v51 = vadd.f32 %v752_v47, %v751_v17 }
 0x220   : > { %v749_v23 = vmul.f32 %v745_v21, %v741_v44 }
 0x221   : > { %v754_v22 = vsel %vm750_vm6, %v748_v49, 0.0 }
 0x222   : > { %v755_v24 = vadd.f32 %v754_v22, %v753_v51  ;;  %v756_v52 = vsel %vm750_vm6, %v749_v23, 0.0 }
 0x224   : > { %v757_v28 = vadd.f32 %v756_v52, %v755_v24 }
 0x226   : > { %v758_v27 = vrot.slane %v757_v28, 4 }
 0x228   : > { %v759_v30 = vadd.f32 %v758_v27, %v757_v28 }
 0x22a   : > { %v760_v53 = vrot.slane %v759_v30, 2 }
 0x22c   : > { %v761_v26 = vadd.f32 %v760_v53, %v759_v30 }
 0x22e   : > { %v762_v54 = vrot.slane %v761_v26, 1 }
 0x230   : > { %v763_v56 = vadd.f32 %v762_v54, %v761_v26 }
 0x232   : > { %v765_v31 = vadd.f32 %v764_v29, %v763_v56 }
 0x234   : > { %v766_v33 = vmax.f32 %v765_v31, 0.0 }
 0x236   : > { %v774_v43 = vrot.slane %v766_v33, %v773_v50 }
 0x238   : > { %v776_v37 = vmul.f32 %v774_v43, %v768_v57  ;;  %v775_v61 = vmul.f32 %v774_v43, %v767_v58  ;;  %v778_v12 = vmul.f32 %v774_v43, %v770_v42  ;;  %v777_v34 = vmul.f32 %v774_v43, %v769_v59 }
 0x23a   : > { %v782_v46 = vsel %vm750_vm6, %v776_v37, 0.0  ;;  %v779_v60 = vsel %vm750_vm6, %v775_v61, 0.0  ;;  %v788_v38 = vsel %vm750_vm6, %v778_v12, 0.0  ;;  %v785_v48 = vsel %vm750_vm6, %v777_v34, 0.0 }
 0x23b   : > { %783 = vadd.xlane.f32.xlu1 %v782_v46  ;;  %780 = vadd.xlane.f32.xlu0 %v779_v60 }
 0x23f   : > { %789 = vadd.xlane.f32.xlu1 %v788_v38  ;;  %786 = vadd.xlane.f32.xlu0 %v785_v48 }
 0x2c4   : > { %v784_v35 = vpop.xlane.xlu1 %783  ;;  %v781_v9 = vpop.xlane.xlu0 %780 }
 0x2c5   : > { %v796_v32 = vadd.f32 %v792_v40, %v784_v35  ;;  %v795_v55 = vadd.f32 %v791_v39, %v781_v9 }
 0x2c7   : > { %v941_v1 = vmul.f32 -1.442695, %v796_v32  ;;  %v940_v13 = vmul.f32 -1.442695, %v795_v55 }
 0x2c8   : > { %v790_v36 = vpop.xlane.xlu1 %789  ;;  %v787_v5 = vpop.xlane.xlu0 %786 }
 0x2c9   : > { %1050 = vpow2.f32 %v941_v1  ;;  %v798_v3 = vadd.f32 %v794_v63, %v790_v36  ;;  %v797_v8 = vadd.f32 %v793_v45, %v787_v5 }
 0x2ca   : > { %1052 = vpow2.f32 %v940_v13 }
 0x2cb   : > { %v943_v18 = vmul.f32 -1.442695, %v798_v3  ;;  %v942_v0 = vmul.f32 -1.442695, %v797_v8 }
 0x2cd   : > { %1054 = vpow2.f32 %v943_v18 }
 0x2ce   : > { %1056 = vpow2.f32 %v942_v0 }
 0x2d6   : > { %v1051_v11 = vpop.eup %1050 }
 0x2d7   : > { %v1053_v10 = vpop.eup %1052  ;;  %v812_v2 = vadd.f32 1.0, %v1051_v11 }
 0x2d8   : > { %v811_v16 = vadd.f32 1.0, %v1053_v10 }
 0x2d9   : > { %1058 = vrcp.f32 %v812_v2 }
 0x2da   : > { %v1055_v4 = vpop.eup %1054  ;;  %1060 = vrcp.f32 %v811_v16 }
 0x2db   : > { %v1057_v19 = vpop.eup %1056  ;;  %v814_v15 = vadd.f32 1.0, %v1055_v4 }
 0x2dc   : > { %v813_v25 = vadd.f32 1.0, %v1057_v19 }
 0x2de   : > { %1062 = vrcp.f32 %v813_v25 }
 0x2df   : > { %1064 = vrcp.f32 %v814_v15 }
 0x2e6   : > { %v1059_v21 = vpop.eup %1058 }
 0x2e7   : > { %v1061_v14 = vpop.eup %1060  ;;  %830 = vperm.xlu1 %1025, %v1059_v21  }
 0x2e8   : > { %825 = vperm.xlu0 %1023, %v1061_v14  }
 0x2eb   : > { %v1063_v17 = vpop.eup %1062 }
 0x2ec   : > { %835 = vperm.xlu1 %1025, %v1063_v17   ;;  %v1065_v44 = vpop.eup %1064 }
 0x2f0   : > { %840 = vperm.xlu1 %1025, %v1065_v44  }
 0x362   : > { %v831_v47 = vpop.permute.xlu1 %830 }
 0x363   : > { %v844_v49 = vmul.f32 %v831_v47, %v1475_v62  ;;  %v826_v51 = vpop.permute.xlu0 %825 }
 0x364   : > { %v843_v23 = vmul.f32 %v826_v51, %v1479_v20 }
 0x365   : > { %848 = vst [vmem:[%s325_s17 + $0x8] sm:$0xff] %v844_v49 }
 0x366   : > { %847 = vst [vmem:[%s325_s17] sm:$0xff] %v843_v23 }
 0x367   : > { %v836_v22 = vpop.permute.xlu1 %835 }
 0x368   : > { %v845_v24 = vmul.f32 %v836_v22, %v1483_v7 }
 0x36a   : > { %849 = vst [vmem:[%s325_s17 + $0x10] sm:$0xff] %v845_v24 }
 0x36b   : > { %v841_v52 = vpop.permute.xlu1 %840 }
 0x36c   : > { %v846_v62 = vmul.f32 %v841_v52, %v1486_v6 }
 0x36e   : > { %850 = vst [vmem:[%s325_s17 + $0x18] sm:$0xff] %v846_v62 }
 0x36f   : > { %1079 = shalt.err (!%p1076_p3)
}
 0x370   : > { %s1080_s14 = scalar_lea.hbm %s1548_s25, 512  ;;  %s1084_s22 = scalar_lea.hbm %s1600_s9, 1024 }
 0x371   : > { %p1081_p4 = scmp.ne.s32.totalorder %s1548_s25, %s1080_s14  ;;  %p1085_p9 = scmp.lt.s32.totalorder %s1548_s25, %s1600_s9 }
 0x372   : > { %p1086_p10 = scmp.lt.s32.totalorder %s1084_s22, %s1080_s14 }
 0x373   : > { %p1082_p7 = pnand %p1081_p4, %p1232_p5 }
 0x374   : > { %p1087_p11 = por %p1086_p10, %p1085_p9 }
 0x375   : > { %p1083_p8 = pneg %p1082_p7 }
 0x377   : > { %p1088_p12 = pnand %p1087_p11, %p1083_p8 }
 0x379   : > { %1091 = shalt.err (!%p1088_p12)
}
 0x37a   : > { %s1142_s27 = smov 128   ;;  %s1143_s13 = smov 8  }
 0x37b   : > { %951 = dma.vmem_to_hbm [thread:$0]  (%p1232_p5), %s1543_s21, 512, %s1548_s25, %s1551_s26, %s1142_s27, %s1142_s27, %s1143_s13  }
 0x37c PF: > { %p957_p13 = scmp.ge.s32.totalorder %s1126_s12, 2  ;;  %s880_s28 = sand.u32 1, %s1114_s30  }
 0x37d   : > { %s881_s29 = scalar_lea.sflag [#allocation3], %s880_s28 }
 0x37e   : > { %p954_p0 = pnand %p957_p13, %p1236_p6 }
 0x380   : > { %p955_p1 = pneg %p954_p0 }
 0x382   : > { %1109 = dma.done.wait (%p955_p1), %s881_s29, 512  }
 0x383   : > { %1111 = vsyncadd (%p955_p1), %s881_s29, 4294966784  ;;  %p19_p2 = scmp.ge.s32.totalorder %s1219_s15, 4   ;;  %s1603_s30 = smov %s1118_s10 }
 0x384   : > { %s1604_s10 = smov %s1122_s11  ;;  %s1605_s11 = smov %s1230_s18 }
 0x385   : > { %s1606_s12 = smov %s1219_s15  ;;  %21 = sbr.rel (!%p19_p2) target bundleno = 3 (0x3), region = 91 }
 0x38a   :  { %886 = vsyncpa [#allocation3], 1 }
 0x38b   :  { %888 = vsyncpa [#allocation3 + $0x1], 1 }

</bundles_post_ra>
